<compile_context>
chip_gen: v7x
topology: tpu7x:2x2x1
jax: 0.10.0
libtpu: 0.0.40
codegen_flags: <defaults>
</compile_context>

<pallas_src>
import math
import jax
import jax.numpy as jnp
from jax.experimental import pallas as pl
from jax.experimental.pallas import tpu as pltpu


def _fm_kernel(x_ref, v_ref, v2sum_ref, wlin_ref, bias_ref, o_ref):
    """Single-pass FM forward for one batch tile.

    x_ref:     [Bt, n]  current batch tile
    v_ref:     [n, k]   factor matrix (resident across all grid steps)
    v2sum_ref: [n, 1]   rowsum(V * V)  (precomputed in wrapper)
    wlin_ref:  [n, 1]   linear weight, already transposed in wrapper
    bias_ref:  [1]      linear bias, SMEM scalar
    o_ref:     [Bt, 1]  output tile
    """
    x = x_ref[...]                                    # [Bt, n] f32

    # Interaction term, stage 1: x @ V on the MXU, f32 accumulation.
    xv = jnp.dot(x, v_ref[...], preferred_element_type=jnp.float32)   # [Bt, k]
    out_1 = jnp.sum(xv * xv, axis=-1, keepdims=True)                  # [Bt, 1]

    # Interaction term, stage 2 collapsed to a matvec: x^2 @ rowsum(V^2).
    out_2 = jnp.dot(x * x, v2sum_ref[...],
                    preferred_element_type=jnp.float32)               # [Bt, 1]

    # Linear term: x @ w_lin + b (weight pre-transposed, no in-kernel .T).
    out_lin = jnp.dot(x, wlin_ref[...],
                      preferred_element_type=jnp.float32) + bias_ref[0]

    o_ref[...] = (0.5 * (out_1 - out_2) + out_lin).astype(o_ref.dtype)


def torch_fm(x, V, lin_w, lin_b, *, block_b=1024):
    """x: [B, n], V: [n, k], lin_w: [1, n], lin_b: [1]  ->  [B, 1]."""
    B, n = x.shape
    k = V.shape[1]

    # Batch tiling: one grid axis, large tiles to amortize per-step overhead.
    if B <= block_b:
        bt = B                      # single step; full-extent block is legal
        Bp = B
    else:
        bt = block_b                # multiple of 8 -> satisfies sublane tiling
        Bp = pl.cdiv(B, bt) * bt
    if Bp != B:
        x = jnp.pad(x, ((0, Bp - B), (0, 0)))

    # Hoisted parameter prep (done once, outside the kernel / grid loop).
    v2sum = jnp.sum(V * V, axis=1, keepdims=True).astype(jnp.float32)  # [n, 1]
    wlin = jnp.transpose(lin_w).astype(jnp.float32)                    # [n, 1]
    bias = jnp.reshape(lin_b, (1,)).astype(jnp.float32)                # [1]

    grid = (Bp // bt,)
    out = pl.pallas_call(
        _fm_kernel,
        out_shape=jax.ShapeDtypeStruct((Bp, 1), x.dtype),
        grid_spec=pltpu.PrefetchScalarGridSpec(
            num_scalar_prefetch=0,
            grid=grid,
            in_specs=[
                # x tile: [bt, n]
                pl.BlockSpec((bt, n), lambda i: (i, 0)),
                # V: resident across all batch tiles (block index constant)
                pl.BlockSpec((n, k), lambda i: (0, 0)),
                # rowsum(V^2): [n, 1], resident
                pl.BlockSpec((n, 1), lambda i: (0, 0)),
                # linear weight (pre-transposed): [n, 1], resident
                pl.BlockSpec((n, 1), lambda i: (0, 0)),
                # linear bias scalar in SMEM
                pl.BlockSpec((1,), lambda i: (0,), memory_space=pltpu.SMEM),
            ],
            out_specs=pl.BlockSpec((bt, 1), lambda i: (i, 0)),
        ),
        compiler_params=pltpu.CompilerParams(
            dimension_semantics=("parallel",),
        ),
    )(x, V, v2sum, wlin, bias)
    return out[:B]


def reference(x, V, lin_w, lin_b):
    out_1 = jnp.sum(jnp.square(x @ V), axis=1, keepdims=True)
    out_2 = jnp.sum((x * x) @ (V * V), axis=1, keepdims=True)
    out_inter = 0.5 * (out_1 - out_2)
    out_lin = x @ jnp.transpose(lin_w) + lin_b
    return out_inter + out_lin


if __name__ == "__main__":
    # Small shapes consistent with the module: batch=8, n=32 features, k=8.
    B, n, k = 8, 32, 8

    key = jax.random.PRNGKey(0)
    kx, kv, kw, kb = jax.random.split(key, 4)

    x = jax.random.normal(kx, (B, n), dtype=jnp.float32)

    # glorot([n, k]): uniform(-r, r), r = sqrt(6 / (n + k))
    r = math.sqrt(6.0 / (n + k))
    V = jax.random.uniform(kv, (n, k), dtype=jnp.float32, minval=-r, maxval=r)

    # nn.Linear(n, 1) default init: uniform(-1/sqrt(n), 1/sqrt(n))
    bound = 1.0 / math.sqrt(n)
    lin_w = jax.random.uniform(kw, (1, n), dtype=jnp.float32,
                               minval=-bound, maxval=bound)
    lin_b = jax.random.uniform(kb, (1,), dtype=jnp.float32,
                               minval=-bound, maxval=bound)

    out = torch_fm(x, V, lin_w, lin_b)
    out = jax.block_until_ready(out)

    ref = reference(x, V, lin_w, lin_b)
    assert out.shape == (B, 1), out.shape
    assert jnp.allclose(out, ref, atol=1e-5, rtol=1e-5), (
        f"max abs err {jnp.max(jnp.abs(out - ref))}")

    print("KERNEL_OK")
</pallas_src>

<mosaic_0001>
module attributes {stable_mosaic.version = 11 : i64} {
  func.func @_fm_kernel(%arg0: i32, %arg1: memref<8x32xf32, #tpu.memory_space<vmem>>, %arg2: memref<32x8xf32, #tpu.memory_space<vmem>>, %arg3: memref<32x1xf32, #tpu.memory_space<vmem>>, %arg4: memref<32x1xf32, #tpu.memory_space<vmem>>, %arg5: memref<1xf32, #tpu.memory_space<smem>>, %arg6: memref<8x1xf32, #tpu.memory_space<vmem>>) attributes {dimension_semantics = [#tpu.dimension_semantics<parallel>], iteration_bounds = array<i64: 1>, scalar_prefetch = 0 : i64, scratch_operands = 0 : i64, tpu.core_type = #tpu.core_type<tc>, window_params = [{transform_indices = @transform_0, window_bounds = array<i64: 8, 32>}, {pipeline_mode = #tpu.pipeline_mode<synchronous>, transform_indices = @transform_1, window_bounds = array<i64: 32, 8>}, {pipeline_mode = #tpu.pipeline_mode<synchronous>, transform_indices = @transform_2, window_bounds = array<i64: 32, 1>}, {pipeline_mode = #tpu.pipeline_mode<synchronous>, transform_indices = @transform_3, window_bounds = array<i64: 32, 1>}, {transform_indices = @transform_4, window_bounds = array<i64: 1>}, {transform_indices = @transform_5, window_bounds = array<i64: 8, 1>}]} {
    %c0 = arith.constant 0 : index
    %c0_0 = arith.constant 0 : index
    %0 = vector.load %arg1[%c0, %c0_0] : memref<8x32xf32, #tpu.memory_space<vmem>>, vector<8x32xf32>
    %c0_1 = arith.constant 0 : index
    %c0_2 = arith.constant 0 : index
    %1 = vector.load %arg2[%c0_1, %c0_2] : memref<32x8xf32, #tpu.memory_space<vmem>>, vector<32x8xf32>
    %cst = arith.constant dense<0.000000e+00> : vector<8x8xf32>
    %2 = tpu.matmul %0, %1, %cst {dimension_numbers = #tpu.dot_dimension_numbers<[1], [0], [0], [1], [0, 0, 1, 1], [], []>} : vector<8x32xf32>, vector<32x8xf32>, vector<8x8xf32> -> vector<8x8xf32>
    %3 = arith.mulf %2, %2 : vector<8x8xf32>
    %cst_3 = arith.constant dense<0.000000e+00> : vector<8xf32>
    %4 = vector.multi_reduction <add>, %3, %cst_3 [1] : vector<8x8xf32> to vector<8xf32>
    %5 = vector.shape_cast %4 : vector<8xf32> to vector<8x1xf32>
    %6 = arith.mulf %0, %0 : vector<8x32xf32>
    %c0_4 = arith.constant 0 : index
    %c0_5 = arith.constant 0 : index
    %7 = vector.load %arg3[%c0_4, %c0_5] : memref<32x1xf32, #tpu.memory_space<vmem>>, vector<32x1xf32>
    %cst_6 = arith.constant dense<0.000000e+00> : vector<8x1xf32>
    %8 = tpu.matmul %6, %7, %cst_6 {dimension_numbers = #tpu.dot_dimension_numbers<[1], [0], [0], [1], [0, 0, 1, 1], [], []>} : vector<8x32xf32>, vector<32x1xf32>, vector<8x1xf32> -> vector<8x1xf32>
    %c0_7 = arith.constant 0 : index
    %c0_8 = arith.constant 0 : index
    %9 = vector.load %arg4[%c0_7, %c0_8] : memref<32x1xf32, #tpu.memory_space<vmem>>, vector<32x1xf32>
    %cst_9 = arith.constant dense<0.000000e+00> : vector<8x1xf32>
    %10 = tpu.matmul %0, %9, %cst_9 {dimension_numbers = #tpu.dot_dimension_numbers<[1], [0], [0], [1], [0, 0, 1, 1], [], []>} : vector<8x32xf32>, vector<32x1xf32>, vector<8x1xf32> -> vector<8x1xf32>
    %c0_10 = arith.constant 0 : index
    %11 = memref.load %arg5[%c0_10] : memref<1xf32, #tpu.memory_space<smem>>
    %12 = vector.broadcast %11 : f32 to vector<8x1xf32>
    %13 = arith.addf %10, %12 : vector<8x1xf32>
    %14 = arith.subf %5, %8 : vector<8x1xf32>
    %cst_11 = arith.constant 5.000000e-01 : f32
    %15 = vector.broadcast %cst_11 : f32 to vector<8x1xf32>
    %16 = arith.mulf %15, %14 : vector<8x1xf32>
    %17 = arith.addf %16, %13 : vector<8x1xf32>
    %c0_12 = arith.constant 0 : index
    %c0_13 = arith.constant 0 : index
    %18 = vector.load %arg6[%c0_12, %c0_13] : memref<8x1xf32, #tpu.memory_space<vmem>>, vector<8x1xf32>
    tpu.vector_store %arg6[%c0_12, %c0_13], %17 {strides = array<i32>} : memref<8x1xf32, #tpu.memory_space<vmem>>, vector<8x1xf32>,
    return
  }
  func.func @transform_0(%arg0: i32) -> (i32, i32) {
    %c0_i32 = arith.constant 0 : i32
    %c0_i32_0 = arith.constant 0 : i32
    return %arg0, %c0_i32 : i32, i32
  }
  func.func @transform_1(%arg0: i32) -> (i32, i32) {
    %c0_i32 = arith.constant 0 : i32
    %c0_i32_0 = arith.constant 0 : i32
    %c0_i32_1 = arith.constant 0 : i32
    return %c0_i32, %c0_i32_0 : i32, i32
  }
  func.func @transform_2(%arg0: i32) -> (i32, i32) {
    %c0_i32 = arith.constant 0 : i32
    %c0_i32_0 = arith.constant 0 : i32
    %c0_i32_1 = arith.constant 0 : i32
    return %c0_i32, %c0_i32_0 : i32, i32
  }
  func.func @transform_3(%arg0: i32) -> (i32, i32) {
    %c0_i32 = arith.constant 0 : i32
    %c0_i32_0 = arith.constant 0 : i32
    %c0_i32_1 = arith.constant 0 : i32
    return %c0_i32, %c0_i32_0 : i32, i32
  }
  func.func @transform_4(%arg0: i32) -> i32 {
    %c0_i32 = arith.constant 0 : i32
    %c0_i32_0 = arith.constant 0 : i32
    return %c0_i32 : i32
  }
  func.func @transform_5(%arg0: i32) -> (i32, i32) {
    %c0_i32 = arith.constant 0 : i32
    %c0_i32_0 = arith.constant 0 : i32
    return %arg0, %c0_i32 : i32, i32
  }
}

</mosaic_0001>

<bundles_post_ra>
// kernel: tpu_custom_call.1
= control target key start
LH: loop header
LB: loop body
LE: loop exit
PB: predicated region body
PF: predicated region fallthrough
CT: control target
= control target key end

     0   :  { %v340_v0 = vmov 0.0|0.0   ;;  %vm341_vm0 = vmmov 0   ;;  %v342_v4 = vmov 0.0   ;;  %vm26_vm1 = vcmask 261120   ;;  %s421_s1 = inlined_call_operand.vmem [shape: f32[32,8], index: 1, kind: input, shape index: {}]   ;;  %s422_s2 = inlined_call_operand.vmem [shape: f32[32,1], index: 2, kind: input, shape index: {}]   ;;  %s423_s3 = inlined_call_operand.vmem [shape: f32[32,1], index: 3, kind: input, shape index: {}]   ;;  %s424_s0 = inlined_call_operand.vmem [shape: f32[8,32], index: 0, kind: input, shape index: {}]   ;;  %s425_s4 = inlined_call_operand.<no memory space> [shape: f32[1], index: 4, kind: input, shape index: {}]   ;;  %s426_s5 = inlined_call_operand.vmem [shape: f32[8,1], index: 5, kind: output, shape index: {}]  }
   0x1   :  { %319 = vmatprep.subr.bf16.mxu0 %v340_v0  ;;  %v22_v1 = vld [vmem:[%s421_s1] sm:$0xff]  ;;  %v23_v2 = vld [vmem:[%s421_s1 + $0x8] sm:$0xff]  ;;  %v24_v3 = vld [vmem:[%s421_s1 + $0x10] sm:$0xff]  ;;  %294 = vmatprep.mubr.msk.f32.mxu0 %vm341_vm0, %v342_v4  ;;  %vm101_vm2 = vcmask 64512   ;;  %v188_v30 = vstv %s425_s4  ;;  %vm262_vm3 = vcmask 7168  }
   0x2   :  { %v320_v5 = vpack.c.bf16 %v23_v2, %v22_v1  ;;  %v25_v6 = vld [vmem:[%s421_s1 + $0x18] sm:$0xff]  ;;  %325 = vmatprep.subr.bf16.mxu1 %v340_v0  ;;  %v106_v7 = vld [vmem:[%s422_s2] sm:$0xff]  ;;  %305 = vmatprep.mubr.msk.f32.mxu1 %vm341_vm0, %v342_v4  ;;  %v107_v8 = vld [vmem:[%s422_s2 + $0x8] sm:$0xff] }
   0x3   :  { %v323_v9 = vpack.c.bf16 %v25_v6, %v24_v3  ;;  %v326_v10 = vpack.c.bf16 %v107_v8, %v106_v7  ;;  %v108_v11 = vld [vmem:[%s422_s2 + $0x10] sm:$0xff]  ;;  %v109_v12 = vld [vmem:[%s422_s2 + $0x18] sm:$0xff]  ;;  %v183_v13 = vld [vmem:[%s423_s3] sm:$0xff] }
   0x4   :  { %321 = vmatpush3.bf16.msra.mxu0 %v320_v5  ;;  %v184_v14 = vld [vmem:[%s423_s3 + $0x8] sm:$0xff]  ;;  %v329_v15 = vpack.c.bf16 %v109_v12, %v108_v11  ;;  %v21_v16 = vld [vmem:[%s424_s0] sm:$0xff]  ;;  %v185_v19 = vld [vmem:[%s423_s3 + $0x10] sm:$0xff] }
   0x5   :  { %322 = vmatprep.subr.bf16.mxu0 %v340_v0  ;;  %327 = vmatpush3.bf16.msra.mxu1 %v326_v10  ;;  %v332_v17 = vpack.c.bf16 %v184_v14, %v183_v13  ;;  %v105_v18 = vmul.f32 %v21_v16, %v21_v16  ;;  %v186_v20 = vld [vmem:[%s423_s3 + $0x18] sm:$0xff] }
   0x6   :  { %328 = vmatprep.subr.bf16.mxu1 %v340_v0  ;;  %v335_v21 = vpack.c.bf16 %v186_v20, %v185_v19 }
   0x8   :  { %324 = vmatpush3.bf16.msra.mxu0 %v323_v9 }
   0x9   :  { %331 = vmatprep.subr.bf16.mxu0 %v340_v0  ;;  %330 = vmatpush3.bf16.msra.mxu1 %v329_v15 }
   0xb   :  { %295 = vmatmul.mubr.msk.f32.vlgmr.msra.gmra.mrb[0].mxu0 %vm26_vm1, %v21_v16 }
   0xc   :  { %333 = vmatpush3.bf16.msra.mxu0 %v332_v17  ;;  %316 = vmatprep.mubr.msk.f32.mxu0 %vm341_vm0, %v342_v4 }
   0xd   :  { %334 = vmatprep.subr.bf16.mxu0 %v340_v0  ;;  %306 = vmatmul.mubr.msk.f32.vlgmr.msra.gmra.mrb[0].mxu1 %vm26_vm1, %v105_v18 }
  0x10   :  { %336 = vmatpush3.bf16.msra.mxu0 %v335_v21 }
  0x13   :  { %317 = vmatmul.mubr.msk.f32.vlgmr.msra.gmra.mrb[2].mxu0 %vm26_vm1, %v21_v16 }
  0xde   :  { %v96_v22 = vpop.f32.mrb[0].mxu0 }
  0xdf   :  { %v100_v23 = vmul.f32 %v96_v22, %v96_v22  ;;  %v296_v24 = vpop.f32.mrb[1].mxu0 }
  0xe0   :  { %v179_v25 = vpop.f32.mrb[0].mxu1 }
  0xe1   :  { %v102_v26 = vsel %vm101_vm2, %v100_v23, 0.0  ;;  %v307_v27 = vpop.f32.mrb[1].mxu1 }
  0xe2   :  { %103 = vadd.xlane.f32.xlu0 %v102_v26 }
  0xe6   :  { %v255_v28 = vpop.f32.mrb[2].mxu0 }
  0xe7   :  { %v318_v29 = vpop.f32.mrb[3].mxu0  ;;  %v256_v33 = vadd.f32 %v255_v28, %v188_v30 }
 0x16f   :  { %v104_v31 = vpop.xlane.xlu0 %103 }
 0x170   :  { %v259_v32 = vsub.f32 %v104_v31, %v179_v25 }
 0x172   :  { %v260_v34 = vmul.f32 0.5, %v259_v32 }
 0x174   :  { %v261_v35 = vadd.f32 %v260_v34, %v256_v33 }
 0x176   :  { %263 = vst.msk [vmem:[%s426_s5] sm:$0xff] %vm262_vm3, %v261_v35 }

</bundles_post_ra>
